<compile_context>
chip_gen: v7x
topology: tpu7x:2x2x1
jax: 0.10.0
libtpu: 0.0.40
codegen_flags: <defaults>
</compile_context>

<pallas_src>
import functools

import jax
import jax.numpy as jnp
from jax.experimental import pallas as pl
from jax.experimental.pallas import tpu as pltpu

LEAKY_SLOPE = 0.01   # torch.nn.LeakyReLU default negative_slope
HIDDEN = 80          # hidden width of the PyTorch module
H_PAD = 128          # hidden width padded to one full lane tile
DEFAULT_TILE_B = 4096


def _leaky_relu(x):
    # max(x, slope*x) == LeakyReLU(x) for slope < 1; 2 VPU ops vs 3.
    return jnp.maximum(x, LEAKY_SLOPE * x)


def _round_up(x, m):
    return ((x + m - 1) // m) * m


def mlp_kernel(x_ref, w1_ref, b1_ref, w2_ref, b2_ref, w3_ref, b3_ref,
               w4_ref, b4_ref, out_ref):
    """Fused 4-layer MLP in transposed (feature-major, batch-on-lanes) layout.

    x_ref:  (1, TILE_B)  f32   input scalar feature, batch on lanes
    w1_ref: (H_PAD, 1)   f32   layer-1 weight column (torch W1 is (80, 1))
    b1/2/3: (H_PAD, 1)   f32   biases as sublane columns
    w2/w3:  (H_PAD, H_PAD) bf16 torch (out, in) weights, zero-padded
    w4_ref: (1, H_PAD)   bf16  final weight row
    b4_ref: (1, 1)       f32   final bias
    out:    (1, TILE_B)  f32   lane-dense output row
    """
    x = x_ref[...]                                       # (1, TILE_B) f32

    # Layer 1: K=1 contraction -> pure VPU broadcast MAC + bias, f32 math.
    h = _leaky_relu(w1_ref[...] * x + b1_ref[...])       # (H_PAD, TILE_B) f32
    h = h.astype(jnp.bfloat16)

    # Layers 2 & 3: bf16 MXU matmuls with f32 accumulation; bias + activation
    # stay in f32, then re-cast so activation traffic is half-width.
    h = _leaky_relu(
        jnp.dot(w2_ref[...], h, preferred_element_type=jnp.float32)
        + b2_ref[...])                                   # (H_PAD, TILE_B) f32
    h = h.astype(jnp.bfloat16)
    h = _leaky_relu(
        jnp.dot(w3_ref[...], h, preferred_element_type=jnp.float32)
        + b3_ref[...])                                   # (H_PAD, TILE_B) f32
    h = h.astype(jnp.bfloat16)

    # Layer 4: out_features=1 -> (1,H_PAD)@(H_PAD,TILE_B), lane-dense result.
    y = jnp.dot(w4_ref[...], h, preferred_element_type=jnp.float32) \
        + b4_ref[...]                                    # (1, TILE_B) f32

    out_ref[...] = y.astype(out_ref.dtype)


def prepare_params(params):
    """Pad torch-layout params (W: (out,in), b: (out,)) to the kernel layout.

    Call ONCE when params are created/updated (hoisted out of the hot path).
    W2/W3/W4 are stored in bf16 for the MXU; W1 and all biases stay f32.
    """
    w1, b1, w2, b2, w3, b3, w4, b4 = params

    def pad_to(a, shape, dtype=jnp.float32):
        z = jnp.zeros(shape, dtype)
        return z.at[tuple(slice(0, s) for s in a.shape)].set(a.astype(dtype))

    w1t = pad_to(jnp.reshape(w1, (HIDDEN, 1)), (H_PAD, 1))
    b1t = pad_to(jnp.reshape(b1, (HIDDEN, 1)), (H_PAD, 1))
    w2t = pad_to(w2, (H_PAD, H_PAD), jnp.bfloat16)
    b2t = pad_to(jnp.reshape(b2, (HIDDEN, 1)), (H_PAD, 1))
    w3t = pad_to(w3, (H_PAD, H_PAD), jnp.bfloat16)
    b3t = pad_to(jnp.reshape(b3, (HIDDEN, 1)), (H_PAD, 1))
    w4t = pad_to(jnp.reshape(w4, (1, HIDDEN)), (1, H_PAD), jnp.bfloat16)
    b4t = jnp.reshape(b4, (1, 1)).astype(jnp.float32)
    return (w1t, b1t, w2t, b2t, w3t, b3t, w4t, b4t)


def _choose_tiling(batch, tile_b_cap):
    """Pick (tile_b, padded_batch) so that any batch spanning more than one
    128-lane tile yields >= 2 grid steps (v7x megacore) with bounded padding,
    and large batches use big tiles to amortize per-step pipeline overhead."""
    b128 = _round_up(max(batch, 1), 128)
    if b128 <= 128:
        tile_b = 128            # single lane tile; nothing to split across TCs
    else:
        half = _round_up((b128 + 1) // 2, 128)
        tile_b = min(tile_b_cap, half)
    b_pad = _round_up(b128, tile_b)
    return tile_b, b_pad


@functools.partial(jax.jit, static_argnames=("tile_b",))
def net_forward(pt, angles, features, scalar_features, kparams,
                tile_b=DEFAULT_TILE_B):
    """Mirrors Net.forward: pt / angles / features are accepted but unused.

    `kparams` must come from prepare_params(params).
    """
    del pt, angles, features  # unused, exactly as in the PyTorch module

    batch = scalar_features.shape[0]
    tb, b_pad = _choose_tiling(batch, tile_b)
    grid = (b_pad // tb,)

    # Transposed layout: batch on lanes.  Single reshape + pad (no scatter);
    # padded lanes stay zero and are sliced off below.
    x_row = scalar_features.astype(jnp.float32).reshape(1, batch)
    x_t = jnp.pad(x_row, ((0, 0), (0, b_pad - batch)))

    x_spec = pl.BlockSpec((1, tb), lambda i: (0, i))
    out_spec = pl.BlockSpec((1, tb), lambda i: (0, i))
    # Weights/biases: one block covering the whole array, resident across steps.
    resident_specs = [pl.BlockSpec(p.shape, lambda i: (0, 0)) for p in kparams]

    y_t = pl.pallas_call(
        mlp_kernel,
        out_shape=jax.ShapeDtypeStruct((1, b_pad), jnp.float32),
        grid=grid,
        in_specs=[x_spec] + resident_specs,
        out_specs=out_spec,
        compiler_params=pltpu.CompilerParams(
            dimension_semantics=("parallel",)),
    )(x_t, *kparams)

    return y_t[0, :batch].reshape(batch, 1)


def init_params(key):
    """torch.nn.Linear-style init: W (out,in), b (out,), U(-1/sqrt(fan_in), .)."""
    dims = [(1, 80), (80, 80), (80, 80), (80, 1)]
    params = []
    for fan_in, fan_out in dims:
        key, kw, kb = jax.random.split(key, 3)
        bound = 1.0 / jnp.sqrt(float(fan_in))
        w = jax.random.uniform(kw, (fan_out, fan_in), jnp.float32, -bound, bound)
        b = jax.random.uniform(kb, (fan_out,), jnp.float32, -bound, bound)
        params += [w, b]
    return tuple(params)


def _reference(scalar_features, params):
    """Plain-JAX f32 reference of the same MLP (torch layout: y = x @ W.T + b)."""
    w1, b1, w2, b2, w3, b3, w4, b4 = params

    def lrelu(x):
        return jnp.where(x > 0, x, LEAKY_SLOPE * x)

    h = lrelu(scalar_features @ w1.T + b1)
    h = lrelu(h @ w2.T + b2)
    h = lrelu(h @ w3.T + b3)
    return h @ w4.T + b4


if __name__ == "__main__":
    key = jax.random.PRNGKey(0)
    k_in, k_pt, k_ang, k_feat, k_param = jax.random.split(key, 5)

    batch = 8
    # scalar_features = ['parton_hadV_angle_phi'] -> one scalar feature / event
    scalar_features = jax.random.normal(k_in, (batch, 1), jnp.float32)
    # Unused-by-forward auxiliary inputs (kept to mirror the module signature).
    pt = jax.random.normal(k_pt, (batch, 4), jnp.float32)
    angles = jax.random.normal(k_ang, (batch, 4), jnp.float32)
    features = jax.random.normal(k_feat, (batch, 6), jnp.float32)

    params = init_params(k_param)
    kparams = prepare_params(params)   # pad/cast once, outside the hot path

    out = net_forward(pt, angles, features, scalar_features, kparams)
    jax.block_until_ready(out)

    ref = _reference(scalar_features, params)
    assert out.shape == (batch, 1)
    # bf16 matmul operands with f32 accumulation: expect ~1e-3..1e-2 abs error
    # vs. the pure-f32 reference, so the 1e-4 check is relaxed accordingly.
    max_diff = float(jnp.max(jnp.abs(out - ref)))
    assert max_diff < 2e-2, f"max abs diff {max_diff}"

    print("KERNEL_OK")
</pallas_src>

<mosaic_0001>
module attributes {stable_mosaic.version = 11 : i64} {
  func.func @mlp_kernel(%arg0: i32, %arg1: memref<1x128xf32, #tpu.memory_space<vmem>>, %arg2: memref<128x1xf32, #tpu.memory_space<vmem>>, %arg3: memref<128x1xf32, #tpu.memory_space<vmem>>, %arg4: memref<128x128xbf16, #tpu.memory_space<vmem>>, %arg5: memref<128x1xf32, #tpu.memory_space<vmem>>, %arg6: memref<128x128xbf16, #tpu.memory_space<vmem>>, %arg7: memref<128x1xf32, #tpu.memory_space<vmem>>, %arg8: memref<1x128xbf16, #tpu.memory_space<vmem>>, %arg9: memref<1x1xf32, #tpu.memory_space<vmem>>, %arg10: memref<1x128xf32, #tpu.memory_space<vmem>>) attributes {dimension_semantics = [#tpu.dimension_semantics<parallel>], iteration_bounds = array<i64: 1>, scalar_prefetch = 0 : i64, scratch_operands = 0 : i64, tpu.core_type = #tpu.core_type<tc>, window_params = [{transform_indices = @transform_0, window_bounds = array<i64: 1, 128>}, {pipeline_mode = #tpu.pipeline_mode<synchronous>, transform_indices = @transform_1, window_bounds = array<i64: 128, 1>}, {pipeline_mode = #tpu.pipeline_mode<synchronous>, transform_indices = @transform_2, window_bounds = array<i64: 128, 1>}, {pipeline_mode = #tpu.pipeline_mode<synchronous>, transform_indices = @transform_3, window_bounds = array<i64: 128, 128>}, {pipeline_mode = #tpu.pipeline_mode<synchronous>, transform_indices = @transform_4, window_bounds = array<i64: 128, 1>}, {pipeline_mode = #tpu.pipeline_mode<synchronous>, transform_indices = @transform_5, window_bounds = array<i64: 128, 128>}, {pipeline_mode = #tpu.pipeline_mode<synchronous>, transform_indices = @transform_6, window_bounds = array<i64: 128, 1>}, {pipeline_mode = #tpu.pipeline_mode<synchronous>, transform_indices = @transform_7, window_bounds = array<i64: 1, 128>}, {pipeline_mode = #tpu.pipeline_mode<synchronous>, transform_indices = @transform_8, window_bounds = array<i64: 1, 1>}, {transform_indices = @transform_9, window_bounds = array<i64: 1, 128>}]} {
    %c0 = arith.constant 0 : index
    %c0_0 = arith.constant 0 : index
    %0 = vector.load %arg1[%c0, %c0_0] : memref<1x128xf32, #tpu.memory_space<vmem>>, vector<1x128xf32>
    %c0_1 = arith.constant 0 : index
    %c0_2 = arith.constant 0 : index
    %1 = vector.load %arg2[%c0_1, %c0_2] : memref<128x1xf32, #tpu.memory_space<vmem>>, vector<128x1xf32>
    %2 = vector.broadcast %1 : vector<128x1xf32> to vector<128x128xf32>
    %3 = vector.broadcast %0 : vector<1x128xf32> to vector<128x128xf32>
    %4 = arith.mulf %2, %3 : vector<128x128xf32>
    %c0_3 = arith.constant 0 : index
    %c0_4 = arith.constant 0 : index
    %5 = vector.load %arg3[%c0_3, %c0_4] : memref<128x1xf32, #tpu.memory_space<vmem>>, vector<128x1xf32>
    %6 = vector.broadcast %5 : vector<128x1xf32> to vector<128x128xf32>
    %7 = arith.addf %4, %6 : vector<128x128xf32>
    %cst = arith.constant 0.00999999977 : f32
    %8 = vector.broadcast %cst : f32 to vector<128x128xf32>
    %9 = arith.mulf %8, %7 : vector<128x128xf32>
    %10 = arith.maximumf %7, %9 : vector<128x128xf32>
    %11 = arith.truncf %10 : vector<128x128xf32> to vector<128x128xbf16>
    %c0_5 = arith.constant 0 : index
    %c0_6 = arith.constant 0 : index
    %12 = vector.load %arg4[%c0_5, %c0_6] : memref<128x128xbf16, #tpu.memory_space<vmem>>, vector<128x128xbf16>
    %cst_7 = arith.constant dense<0.000000e+00> : vector<128x128xf32>
    %13 = tpu.matmul %12, %11, %cst_7 {dimension_numbers = #tpu.dot_dimension_numbers<[1], [0], [0], [1], [0, 0, 1, 1], [], []>} : vector<128x128xbf16>, vector<128x128xbf16>, vector<128x128xf32> -> vector<128x128xf32>
    %c0_8 = arith.constant 0 : index
    %c0_9 = arith.constant 0 : index
    %14 = vector.load %arg5[%c0_8, %c0_9] : memref<128x1xf32, #tpu.memory_space<vmem>>, vector<128x1xf32>
    %15 = vector.broadcast %14 : vector<128x1xf32> to vector<128x128xf32>
    %16 = arith.addf %13, %15 : vector<128x128xf32>
    %cst_10 = arith.constant 0.00999999977 : f32
    %17 = vector.broadcast %cst_10 : f32 to vector<128x128xf32>
    %18 = arith.mulf %17, %16 : vector<128x128xf32>
    %19 = arith.maximumf %16, %18 : vector<128x128xf32>
    %20 = arith.truncf %19 : vector<128x128xf32> to vector<128x128xbf16>
    %c0_11 = arith.constant 0 : index
    %c0_12 = arith.constant 0 : index
    %21 = vector.load %arg6[%c0_11, %c0_12] : memref<128x128xbf16, #tpu.memory_space<vmem>>, vector<128x128xbf16>
    %cst_13 = arith.constant dense<0.000000e+00> : vector<128x128xf32>
    %22 = tpu.matmul %21, %20, %cst_13 {dimension_numbers = #tpu.dot_dimension_numbers<[1], [0], [0], [1], [0, 0, 1, 1], [], []>} : vector<128x128xbf16>, vector<128x128xbf16>, vector<128x128xf32> -> vector<128x128xf32>
    %c0_14 = arith.constant 0 : index
    %c0_15 = arith.constant 0 : index
    %23 = vector.load %arg7[%c0_14, %c0_15] : memref<128x1xf32, #tpu.memory_space<vmem>>, vector<128x1xf32>
    %24 = vector.broadcast %23 : vector<128x1xf32> to vector<128x128xf32>
    %25 = arith.addf %22, %24 : vector<128x128xf32>
    %cst_16 = arith.constant 0.00999999977 : f32
    %26 = vector.broadcast %cst_16 : f32 to vector<128x128xf32>
    %27 = arith.mulf %26, %25 : vector<128x128xf32>
    %28 = arith.maximumf %25, %27 : vector<128x128xf32>
    %29 = arith.truncf %28 : vector<128x128xf32> to vector<128x128xbf16>
    %c0_17 = arith.constant 0 : index
    %c0_18 = arith.constant 0 : index
    %30 = vector.load %arg8[%c0_17, %c0_18] : memref<1x128xbf16, #tpu.memory_space<vmem>>, vector<1x128xbf16>
    %cst_19 = arith.constant dense<0.000000e+00> : vector<1x128xf32>
    %31 = tpu.matmul %30, %29, %cst_19 {dimension_numbers = #tpu.dot_dimension_numbers<[1], [0], [0], [1], [0, 0, 1, 1], [], []>} : vector<1x128xbf16>, vector<128x128xbf16>, vector<1x128xf32> -> vector<1x128xf32>
    %c0_20 = arith.constant 0 : index
    %c0_21 = arith.constant 0 : index
    %32 = vector.load %arg9[%c0_20, %c0_21] : memref<1x1xf32, #tpu.memory_space<vmem>>, vector<1x1xf32>
    %33 = vector.broadcast %32 : vector<1x1xf32> to vector<1x128xf32>
    %34 = arith.addf %31, %33 : vector<1x128xf32>
    %c0_22 = arith.constant 0 : index
    %c0_23 = arith.constant 0 : index
    %35 = vector.load %arg10[%c0_22, %c0_23] : memref<1x128xf32, #tpu.memory_space<vmem>>, vector<1x128xf32>
    tpu.vector_store %arg10[%c0_22, %c0_23], %34 {strides = array<i32>} : memref<1x128xf32, #tpu.memory_space<vmem>>, vector<1x128xf32>,
    return
  }
  func.func @transform_0(%arg0: i32) -> (i32, i32) {
    %c0_i32 = arith.constant 0 : i32
    %c0_i32_0 = arith.constant 0 : i32
    return %c0_i32, %arg0 : i32, i32
  }
  func.func @transform_1(%arg0: i32) -> (i32, i32) {
    %c0_i32 = arith.constant 0 : i32
    %c0_i32_0 = arith.constant 0 : i32
    %c0_i32_1 = arith.constant 0 : i32
    return %c0_i32, %c0_i32_0 : i32, i32
  }
  func.func @transform_2(%arg0: i32) -> (i32, i32) {
    %c0_i32 = arith.constant 0 : i32
    %c0_i32_0 = arith.constant 0 : i32
    %c0_i32_1 = arith.constant 0 : i32
    return %c0_i32, %c0_i32_0 : i32, i32
  }
  func.func @transform_3(%arg0: i32) -> (i32, i32) {
    %c0_i32 = arith.constant 0 : i32
    %c0_i32_0 = arith.constant 0 : i32
    %c0_i32_1 = arith.constant 0 : i32
    return %c0_i32, %c0_i32_0 : i32, i32
  }
  func.func @transform_4(%arg0: i32) -> (i32, i32) {
    %c0_i32 = arith.constant 0 : i32
    %c0_i32_0 = arith.constant 0 : i32
    %c0_i32_1 = arith.constant 0 : i32
    return %c0_i32, %c0_i32_0 : i32, i32
  }
  func.func @transform_5(%arg0: i32) -> (i32, i32) {
    %c0_i32 = arith.constant 0 : i32
    %c0_i32_0 = arith.constant 0 : i32
    %c0_i32_1 = arith.constant 0 : i32
    return %c0_i32, %c0_i32_0 : i32, i32
  }
  func.func @transform_6(%arg0: i32) -> (i32, i32) {
    %c0_i32 = arith.constant 0 : i32
    %c0_i32_0 = arith.constant 0 : i32
    %c0_i32_1 = arith.constant 0 : i32
    return %c0_i32, %c0_i32_0 : i32, i32
  }
  func.func @transform_7(%arg0: i32) -> (i32, i32) {
    %c0_i32 = arith.constant 0 : i32
    %c0_i32_0 = arith.constant 0 : i32
    %c0_i32_1 = arith.constant 0 : i32
    return %c0_i32, %c0_i32_0 : i32, i32
  }
  func.func @transform_8(%arg0: i32) -> (i32, i32) {
    %c0_i32 = arith.constant 0 : i32
    %c0_i32_0 = arith.constant 0 : i32
    %c0_i32_1 = arith.constant 0 : i32
    return %c0_i32, %c0_i32_0 : i32, i32
  }
  func.func @transform_9(%arg0: i32) -> (i32, i32) {
    %c0_i32 = arith.constant 0 : i32
    %c0_i32_0 = arith.constant 0 : i32
    return %c0_i32, %arg0 : i32, i32
  }
}

</mosaic_0001>

<bundles_post_ra>
// kernel: net_forward.1
= control target key start
LH: loop header
LB: loop body
LE: loop exit
PB: predicated region body
PF: predicated region fallthrough
CT: control target
= control target key end

     0   :  { %v1119_v0 = vmov 0   ;;  %vm1121_vm0 = vmmov 0   ;;  %s1451_s2 = inlined_call_operand.vmem [shape: f32[128,1], index: 2, kind: input, shape index: {}]   ;;  %s1452_s1 = inlined_call_operand.vmem [shape: f32[128,1], index: 1, kind: input, shape index: {}]   ;;  %s1453_s8 = inlined_call_operand.<no memory space> [shape: f32[1,1], index: 8, kind: input, shape index: {}]   ;;  %s1454_s4 = inlined_call_operand.vmem [shape: f32[128,1], index: 4, kind: input, shape index: {}]   ;;  %s1455_s3 = inlined_call_operand.vmem [shape: bf16[128,128], index: 3, kind: input, shape index: {}]   ;;  %s1456_s6 = inlined_call_operand.vmem [shape: f32[128,1], index: 6, kind: input, shape index: {}]   ;;  %s1457_s0 = inlined_call_operand.vmem [shape: f32[1,128], index: 0, kind: input, shape index: {}]   ;;  %s1458_s5 = inlined_call_operand.vmem [shape: bf16[128,128], index: 5, kind: input, shape index: {}]   ;;  %s1459_s7 = inlined_call_operand.vmem [shape: bf16[1,128], index: 7, kind: input, shape index: {}]   ;;  %s1460_s9 = inlined_call_operand.vmem [shape: f32[1,128], index: 9, kind: output, shape index: {}]  }
   0x1   :  { %1102 = vset.pattern.permute.xlu1 %v1119_v0  ;;  %1101 = vset.pattern.permute.xlu0 %v1119_v0  ;;  %v154_v1 = vld [vmem:[%s1451_s2] sm:$0xff]  ;;  %v14_v3 = vstv %s1453_s8  ;;  %v155_v4 = vld [vmem:[%s1451_s2 + $0x8] sm:$0xff]  ;;  %v39_v6 = vld [vmem:[%s1452_s1 + $0x18] sm:$0xff] }
   0x2   :  { %v36_v2 = vld [vmem:[%s1452_s1] sm:$0xff]  ;;  %172 = vperm.xlu1 %1102, %v154_v1   ;;  %15 = vst [vmem:[#allocation2] sm:$0x1] %v14_v3  ;;  %v37_v5 = vld [vmem:[%s1452_s1 + $0x8] sm:$0xff]  ;;  %v38_v7 = vld [vmem:[%s1452_s1 + $0x10] sm:$0xff] }
   0x3   :  { %54 = vperm.xlu0 %1101, %v36_v2   ;;  %v157_v8 = vld [vmem:[%s1451_s2 + $0x18] sm:$0xff]  ;;  %v156_v9 = vld [vmem:[%s1451_s2 + $0x10] sm:$0xff]  ;;  %v41_v10 = vld [vmem:[%s1452_s1 + $0x28] sm:$0xff] }
   0x4   :  { %v40_v11 = vld [vmem:[%s1452_s1 + $0x20] sm:$0xff]  ;;  %v159_v12 = vld [vmem:[%s1451_s2 + $0x28] sm:$0xff]  ;;  %v43_v14 = vld [vmem:[%s1452_s1 + $0x38] sm:$0xff] }
   0x5   :  { %v158_v13 = vld [vmem:[%s1451_s2 + $0x20] sm:$0xff]  ;;  %v42_v15 = vld [vmem:[%s1452_s1 + $0x30] sm:$0xff]  ;;  %v161_v16 = vld [vmem:[%s1451_s2 + $0x38] sm:$0xff] }
   0x6   :  { %177 = vperm.xlu1 %1102, %v155_v4   ;;  %v160_v17 = vld [vmem:[%s1451_s2 + $0x30] sm:$0xff]  ;;  %v45_v18 = vld [vmem:[%s1452_s1 + $0x48] sm:$0xff]  ;;  %v44_v19 = vld [vmem:[%s1452_s1 + $0x40] sm:$0xff] }
   0x7   :  { %59 = vperm.xlu0 %1101, %v37_v5   ;;  %v163_v20 = vld [vmem:[%s1451_s2 + $0x48] sm:$0xff]  ;;  %v162_v21 = vld [vmem:[%s1451_s2 + $0x40] sm:$0xff]  ;;  %v47_v22 = vld [vmem:[%s1452_s1 + $0x58] sm:$0xff] }
   0x8   :  { %v46_v23 = vld [vmem:[%s1452_s1 + $0x50] sm:$0xff]  ;;  %v165_v24 = vld [vmem:[%s1451_s2 + $0x58] sm:$0xff]  ;;  %v49_v26 = vld [vmem:[%s1452_s1 + $0x68] sm:$0xff] }
   0x9   :  { %v164_v25 = vld [vmem:[%s1451_s2 + $0x50] sm:$0xff]  ;;  %v48_v27 = vld [vmem:[%s1452_s1 + $0x60] sm:$0xff]  ;;  %v167_v28 = vld [vmem:[%s1451_s2 + $0x68] sm:$0xff] }
   0xa   :  { %69 = vperm.xlu1 %1102, %v39_v6   ;;  %v166_v29 = vld [vmem:[%s1451_s2 + $0x60] sm:$0xff]  ;;  %v51_v30 = vld [vmem:[%s1452_s1 + $0x78] sm:$0xff]  ;;  %v50_v31 = vld [vmem:[%s1452_s1 + $0x70] sm:$0xff] }
   0xb   :  { %64 = vperm.xlu0 %1101, %v38_v7   ;;  %v169_v32 = vld [vmem:[%s1451_s2 + $0x78] sm:$0xff]  ;;  %v168_v33 = vld [vmem:[%s1451_s2 + $0x70] sm:$0xff]  ;;  %v323_v34 = vld [vmem:[%s1454_s4 + $0x8] sm:$0xff] }
   0xc   :  { %v322_v35 = vld [vmem:[%s1454_s4] sm:$0xff]  ;;  %v325_v36 = vld [vmem:[%s1454_s4 + $0x18] sm:$0xff]  ;;  %v324_v37 = vld [vmem:[%s1454_s4 + $0x10] sm:$0xff] }
   0xd   :  { %v327_v38 = vld [vmem:[%s1454_s4 + $0x28] sm:$0xff]  ;;  %v326_v39 = vld [vmem:[%s1454_s4 + $0x20] sm:$0xff]  ;;  %v329_v41 = vld [vmem:[%s1454_s4 + $0x38] sm:$0xff] }
   0xe   :  { %187 = vperm.xlu1 %1102, %v157_v8   ;;  %v1103_v40 = vld [vmem:[%s1455_s3] sm:$0xff]   ;;  %v328_v42 = vld [vmem:[%s1454_s4 + $0x30] sm:$0xff]  ;;  %v331_v43 = vld [vmem:[%s1454_s4 + $0x48] sm:$0xff] }
   0xf   :  { %182 = vperm.xlu0 %1101, %v156_v9   ;;  %1030 = vmatprep.mubr.bf16.mxu0 %v1103_v40  ;;  %v330_v44 = vld [vmem:[%s1454_s4 + $0x40] sm:$0xff]  ;;  %v333_v45 = vld [vmem:[%s1454_s4 + $0x58] sm:$0xff]  ;;  %v332_v46 = vld [vmem:[%s1454_s4 + $0x50] sm:$0xff] }
  0x10   :  { %v335_v47 = vld [vmem:[%s1454_s4 + $0x68] sm:$0xff]  ;;  %v334_v48 = vld [vmem:[%s1454_s4 + $0x60] sm:$0xff]  ;;  %v337_v49 = vld [vmem:[%s1454_s4 + $0x78] sm:$0xff] }
  0x11   :  { %v336_v50 = vld [vmem:[%s1454_s4 + $0x70] sm:$0xff]  ;;  %v620_v51 = vld [vmem:[%s1456_s6 + $0x8] sm:$0xff]  ;;  %v619_v52 = vld [vmem:[%s1456_s6] sm:$0xff] }
  0x12   :  { %79 = vperm.xlu1 %1102, %v41_v10   ;;  %v622_v53 = vld [vmem:[%s1456_s6 + $0x18] sm:$0xff]  ;;  %v621_v54 = vld [vmem:[%s1456_s6 + $0x10] sm:$0xff]  ;;  %v624_v55 = vld [vmem:[%s1456_s6 + $0x28] sm:$0xff] }
  0x13   :  { %74 = vperm.xlu0 %1101, %v40_v11   ;;  %v623_v56 = vld [vmem:[%s1456_s6 + $0x20] sm:$0xff]  ;;  %v626_v57 = vld [vmem:[%s1456_s6 + $0x38] sm:$0xff]  ;;  %v625_v58 = vld [vmem:[%s1456_s6 + $0x30] sm:$0xff] }
  0x14   :  { %v628_v59 = vld [vmem:[%s1456_s6 + $0x48] sm:$0xff]  ;;  %v627_v60 = vld [vmem:[%s1456_s6 + $0x40] sm:$0xff]  ;;  %v630_v61 = vld [vmem:[%s1456_s6 + $0x58] sm:$0xff] }
  0x15   :  { %v629_v62 = vld [vmem:[%s1456_s6 + $0x50] sm:$0xff]  ;;  %v632_v63 = vld [vmem:[%s1456_s6 + $0x68] sm:$0xff]  ;;  %v631_v0 = vld [vmem:[%s1456_s6 + $0x60] sm:$0xff] }
  0x16   :  { %197 = vperm.xlu1 %1102, %v159_v12   ;;  %v634_v1 = vld [vmem:[%s1456_s6 + $0x78] sm:$0xff]  ;;  %v633_v2 = vld [vmem:[%s1456_s6 + $0x70] sm:$0xff]  ;;  %v1373_v3 = vld [vmem:[%s1457_s0] ss:$0 sm:$0xff] }
  0x17   :  { %192 = vperm.xlu0 %1101, %v158_v13   ;;  %v901_v4 = vld [vmem:[#allocation2] sm:$0x1] }
  0x1a   :  { %89 = vperm.xlu1 %1102, %v43_v14  }
  0x1b   :  { %84 = vperm.xlu0 %1101, %v42_v15  }
  0x1e   :  { %207 = vperm.xlu1 %1102, %v161_v16  }
  0x1f   :  { %202 = vperm.xlu0 %1101, %v160_v17  }
  0x22   :  { %99 = vperm.xlu1 %1102, %v45_v18  }
  0x23   :  { %94 = vperm.xlu0 %1101, %v44_v19  }
  0x26   :  { %217 = vperm.xlu1 %1102, %v163_v20  }
  0x27   :  { %212 = vperm.xlu0 %1101, %v162_v21  }
  0x2a   :  { %109 = vperm.xlu1 %1102, %v47_v22  }
  0x2b   :  { %104 = vperm.xlu0 %1101, %v46_v23  }
  0x2e   :  { %227 = vperm.xlu1 %1102, %v165_v24  }
  0x2f   :  { %222 = vperm.xlu0 %1101, %v164_v25  }
  0x32   :  { %119 = vperm.xlu1 %1102, %v49_v26  }
  0x33   :  { %114 = vperm.xlu0 %1101, %v48_v27  }
  0x36   :  { %237 = vperm.xlu1 %1102, %v167_v28  }
  0x37   :  { %232 = vperm.xlu0 %1101, %v166_v29  }
  0x3a   :  { %129 = vperm.xlu1 %1102, %v51_v30  }
  0x3b   :  { %124 = vperm.xlu0 %1101, %v50_v31  }
  0x3e   :  { %247 = vperm.xlu1 %1102, %v169_v32  }
  0x3f   :  { %242 = vperm.xlu0 %1101, %v168_v33  }
  0x42   :  { %345 = vperm.xlu1 %1102, %v323_v34  }
  0x43   :  { %340 = vperm.xlu0 %1101, %v322_v35  }
  0x46   :  { %355 = vperm.xlu1 %1102, %v325_v36  }
  0x47   :  { %350 = vperm.xlu0 %1101, %v324_v37  }
  0x4a   :  { %365 = vperm.xlu1 %1102, %v327_v38  }
  0x4b   :  { %360 = vperm.xlu0 %1101, %v326_v39  }
  0x4e   :  { %375 = vperm.xlu1 %1102, %v329_v41  }
  0x4f   :  { %370 = vperm.xlu0 %1101, %v328_v42  }
  0x52   :  { %385 = vperm.xlu1 %1102, %v331_v43  }
  0x53   :  { %380 = vperm.xlu0 %1101, %v330_v44  }
  0x56   :  { %395 = vperm.xlu1 %1102, %v333_v45  }
  0x57   :  { %390 = vperm.xlu0 %1101, %v332_v46  }
  0x5a   :  { %405 = vperm.xlu1 %1102, %v335_v47  }
  0x5b   :  { %400 = vperm.xlu0 %1101, %v334_v48  }
  0x5e   :  { %415 = vperm.xlu1 %1102, %v337_v49  }
  0x5f   :  { %410 = vperm.xlu0 %1101, %v336_v50  }
  0x62   :  { %642 = vperm.xlu1 %1102, %v620_v51  }
  0x63   :  { %637 = vperm.xlu0 %1101, %v619_v52  }
  0x66   :  { %652 = vperm.xlu1 %1102, %v622_v53  }
  0x67   :  { %647 = vperm.xlu0 %1101, %v621_v54  }
  0x6a   :  { %662 = vperm.xlu1 %1102, %v624_v55  }
  0x6b   :  { %657 = vperm.xlu0 %1101, %v623_v56  }
  0x6e   :  { %672 = vperm.xlu1 %1102, %v626_v57  }
  0x6f   :  { %667 = vperm.xlu0 %1101, %v625_v58  }
  0x72   :  { %682 = vperm.xlu1 %1102, %v628_v59  }
  0x73   :  { %677 = vperm.xlu0 %1101, %v627_v60  }
  0x76   :  { %692 = vperm.xlu1 %1102, %v630_v61  }
  0x77   :  { %687 = vperm.xlu0 %1101, %v629_v62  }
  0x7a   :  { %702 = vperm.xlu1 %1102, %v632_v63  }
  0x7b   :  { %697 = vperm.xlu0 %1101, %v631_v0  }
  0x7e   :  { %712 = vperm.xlu1 %1102, %v634_v1  }
  0x7f   :  { %707 = vperm.xlu0 %1101, %v633_v2  }
  0x81   :  { %v173_v5 = vpop.permute.xlu1 %172 }
  0x82   :  { %v55_v6 = vpop.permute.xlu0 %54 }
  0x83   :  { %v138_v7 = vmul.f32 %v1373_v3, %v55_v6  ;;  %904 = vperm.xlu0 %1101, %v901_v4  }
  0x85   :  { %v250_v8 = vadd.f32 %v173_v5, %v138_v7  ;;  %v178_v9 = vpop.permute.xlu1 %177 }
  0x86   :  { %v60_v10 = vpop.permute.xlu0 %59 }
  0x87   :  { %v139_v11 = vmul.f32 %v1373_v3, %v60_v10  ;;  %v266_v12 = vmul.f32 0.01, %v250_v8 }
  0x89   :  { %v251_v13 = vadd.f32 %v178_v9, %v139_v11  ;;  %v70_v14 = vpop.permute.xlu1 %69  ;;  %v282_v19 = vmax.f32 %v250_v8, %v266_v12 }
  0x8a   :  { %v65_v15 = vpop.permute.xlu0 %64  ;;  %v141_v17 = vmul.f32 %v1373_v3, %v70_v14 }
  0x8b   :  { %v267_v16 = vmul.f32 0.01, %v251_v13  ;;  %v140_v18 = vmul.f32 %v1373_v3, %v65_v15 }
  0x8d   :  { %v283_v20 = vmax.f32 %v251_v13, %v267_v16  ;;  %v188_v21 = vpop.permute.xlu1 %187 }
  0x8e   :  { %v183_v22 = vpop.permute.xlu0 %182  ;;  %v253_v23 = vadd.f32 %v188_v21, %v141_v17 }
  0x8f   :  { %v252_v24 = vadd.f32 %v183_v22, %v140_v18  ;;  %v298_v25 = vpack.c.bf16 %v283_v20, %v282_v19 }
  0x90   :  { %v269_v26 = vmul.f32 0.01, %v253_v23 }
  0x91   :  { %v268_v27 = vmul.f32 0.01, %v252_v24  ;;  %1014 = vmatprep.subr.bf16.mxu0 %v298_v25  ;;  %v80_v28 = vpop.permute.xlu1 %79 }
  0x92   :  { %v75_v29 = vpop.permute.xlu0 %74  ;;  %1015 = vmatpush3.bf16.msra.mxu0 %v298_v25  ;;  %v285_v30 = vmax.f32 %v253_v23, %v269_v26  ;;  %v143_v32 = vmul.f32 %v1373_v3, %v80_v28 }
  0x93   :  { %v284_v31 = vmax.f32 %v252_v24, %v268_v27  ;;  %v142_v33 = vmul.f32 %v1373_v3, %v75_v29 }
  0x95   :  { %v299_v34 = vpack.c.bf16 %v285_v30, %v284_v31  ;;  %v198_v35 = vpop.permute.xlu1 %197 }
  0x96   :  { %v193_v36 = vpop.permute.xlu0 %192  ;;  %v255_v37 = vadd.f32 %v198_v35, %v143_v32 }
  0x97   :  { %v254_v38 = vadd.f32 %v193_v36, %v142_v33  ;;  %1016 = vmatprep.subr.bf16.mxu0 %v299_v34 }
  0x98   :  { %1017 = vmatpush3.bf16.msra.mxu0 %v299_v34  ;;  %v271_v39 = vmul.f32 0.01, %v255_v37 }
  0x99   :  { %v270_v40 = vmul.f32 0.01, %v254_v38  ;;  %v90_v41 = vpop.permute.xlu1 %89 }
  0x9a   :  { %v85_v42 = vpop.permute.xlu0 %84  ;;  %v287_v43 = vmax.f32 %v255_v37, %v271_v39  ;;  %v145_v45 = vmul.f32 %v1373_v3, %v90_v41 }
  0x9b   :  { %v286_v44 = vmax.f32 %v254_v38, %v270_v40  ;;  %v144_v46 = vmul.f32 %v1373_v3, %v85_v42 }
  0x9d   :  { %v300_v47 = vpack.c.bf16 %v287_v43, %v286_v44  ;;  %v208_v48 = vpop.permute.xlu1 %207 }
  0x9e   :  { %v203_v49 = vpop.permute.xlu0 %202  ;;  %v257_v50 = vadd.f32 %v208_v48, %v145_v45  ;;  %v1107_v48 = vld [vmem:[%s1455_s3 + $0x20] sm:$0xff]  }
  0x9f   :  { %v256_v51 = vadd.f32 %v203_v49, %v144_v46  ;;  %1018 = vmatprep.subr.bf16.mxu0 %v300_v47  ;;  %v1104_v46 = vld [vmem:[%s1455_s3 + $0x8] sm:$0xff]  }
  0xa0   :  { %1019 = vmatpush3.bf16.msra.mxu0 %v300_v47  ;;  %v273_v52 = vmul.f32 0.01, %v257_v50  ;;  %v1106_v47 = vld [vmem:[%s1455_s3 + $0x18] sm:$0xff]   ;;  %v1108_v49 = vld [vmem:[%s1455_s3 + $0x28] sm:$0xff]  }
  0xa1   :  { %v272_v53 = vmul.f32 0.01, %v256_v51  ;;  %v100_v54 = vpop.permute.xlu1 %99 }
  0xa2   :  { %v95_v55 = vpop.permute.xlu0 %94  ;;  %v289_v56 = vmax.f32 %v257_v50, %v273_v52  ;;  %v147_v58 = vmul.f32 %v1373_v3, %v100_v54  ;;  %v1109_v50 = vld [vmem:[%s1455_s3 + $0x30] sm:$0xff]   ;;  %v1111_v52 = vld [vmem:[%s1458_s5] sm:$0xff]  }
  0xa3   :  { %v288_v57 = vmax.f32 %v256_v51, %v272_v53  ;;  %v146_v59 = vmul.f32 %v1373_v3, %v95_v55  ;;  %v1110_v51 = vld [vmem:[%s1455_s3 + $0x38] sm:$0xff]   ;;  %1062 = vmatprep.mubr.bf16.mxu1 %v1111_v52 }
  0xa5   :  { %v301_v60 = vpack.c.bf16 %v289_v56, %v288_v57  ;;  %v218_v61 = vpop.permute.xlu1 %217 }
  0xa6   :  { %v213_v62 = vpop.permute.xlu0 %212  ;;  %v259_v63 = vadd.f32 %v218_v61, %v147_v58 }
  0xa7   :  { %v258_v0 = vadd.f32 %v213_v62, %v146_v59  ;;  %1020 = vmatprep.subr.bf16.mxu0 %v301_v60 }
  0xa8   :  { %1021 = vmatpush3.bf16.msra.mxu0 %v301_v60  ;;  %v275_v1 = vmul.f32 0.01, %v259_v63 }
  0xa9   :  { %v274_v2 = vmul.f32 0.01, %v258_v0  ;;  %v110_v4 = vpop.permute.xlu1 %109 }
  0xaa   :  { %v105_v5 = vpop.permute.xlu0 %104  ;;  %v291_v6 = vmax.f32 %v259_v63, %v275_v1  ;;  %v149_v8 = vmul.f32 %v1373_v3, %v110_v4 }
  0xab   :  { %v290_v7 = vmax.f32 %v258_v0, %v274_v2  ;;  %v148_v9 = vmul.f32 %v1373_v3, %v105_v5 }
  0xad   :  { %v302_v10 = vpack.c.bf16 %v291_v6, %v290_v7  ;;  %v228_v11 = vpop.permute.xlu1 %227 }
  0xae   :  { %v223_v12 = vpop.permute.xlu0 %222  ;;  %v261_v13 = vadd.f32 %v228_v11, %v149_v8 }
  0xaf   :  { %v260_v14 = vadd.f32 %v223_v12, %v148_v9  ;;  %1022 = vmatprep.subr.bf16.mxu0 %v302_v10 }
  0xb0   :  { %1023 = vmatpush3.bf16.msra.mxu0 %v302_v10  ;;  %v277_v15 = vmul.f32 0.01, %v261_v13 }
  0xb1   :  { %v276_v16 = vmul.f32 0.01, %v260_v14  ;;  %v120_v17 = vpop.permute.xlu1 %119 }
  0xb2   :  { %v115_v18 = vpop.permute.xlu0 %114  ;;  %v293_v19 = vmax.f32 %v261_v13, %v277_v15  ;;  %v151_v21 = vmul.f32 %v1373_v3, %v120_v17 }
  0xb3   :  { %v292_v20 = vmax.f32 %v260_v14, %v276_v16  ;;  %v150_v22 = vmul.f32 %v1373_v3, %v115_v18 }
  0xb5   :  { %v303_v23 = vpack.c.bf16 %v293_v19, %v292_v20  ;;  %v238_v24 = vpop.permute.xlu1 %237 }
  0xb6   :  { %v233_v25 = vpop.permute.xlu0 %232  ;;  %v263_v26 = vadd.f32 %v238_v24, %v151_v21 }
  0xb7   :  { %v262_v27 = vadd.f32 %v233_v25, %v150_v22  ;;  %1024 = vmatprep.subr.bf16.mxu0 %v303_v23 }
  0xb8   :  { %1025 = vmatpush3.bf16.msra.mxu0 %v303_v23  ;;  %v279_v28 = vmul.f32 0.01, %v263_v26 }
  0xb9   :  { %v278_v29 = vmul.f32 0.01, %v262_v27  ;;  %v130_v30 = vpop.permute.xlu1 %129 }
  0xba   :  { %v125_v31 = vpop.permute.xlu0 %124  ;;  %v295_v32 = vmax.f32 %v263_v26, %v279_v28  ;;  %v153_v34 = vmul.f32 %v1373_v3, %v130_v30 }
  0xbb   :  { %v294_v33 = vmax.f32 %v262_v27, %v278_v29  ;;  %v152_v35 = vmul.f32 %v1373_v3, %v125_v31  ;;  %v1105_v3 = vld [vmem:[%s1455_s3 + $0x10] sm:$0xff]  }
  0xbd   :  { %v304_v36 = vpack.c.bf16 %v295_v32, %v294_v33  ;;  %v248_v37 = vpop.permute.xlu1 %247 }
  0xbe   :  { %v243_v38 = vpop.permute.xlu0 %242  ;;  %v265_v39 = vadd.f32 %v248_v37, %v153_v34 }
  0xbf   :  { %v264_v40 = vadd.f32 %v243_v38, %v152_v35  ;;  %1026 = vmatprep.subr.bf16.mxu0 %v304_v36 }
  0xc0   :  { %1027 = vmatpush3.bf16.msra.mxu0 %v304_v36  ;;  %v281_v41 = vmul.f32 0.01, %v265_v39 }
  0xc1   :  { %v280_v42 = vmul.f32 0.01, %v264_v40  ;;  %v346_v54 = vpop.permute.xlu1 %345 }
  0xc2   :  { %v297_v43 = vmax.f32 %v265_v39, %v281_v41  ;;  %v341_v53 = vpop.permute.xlu0 %340 }
  0xc3   :  { %v296_v44 = vmax.f32 %v264_v40, %v280_v42 }
  0xc5   :  { %v305_v45 = vpack.c.bf16 %v297_v43, %v296_v44  ;;  %v356_v56 = vpop.permute.xlu1 %355 }
  0xc6   :  { %v351_v55 = vpop.permute.xlu0 %350 }
  0xc7   :  { %1028 = vmatprep.subr.bf16.mxu0 %v305_v45 }
  0xc8   :  { %1029 = vmatpush3.bf16.msra.mxu0 %v305_v45 }
  0xc9   :  { %v366_v58 = vpop.permute.xlu1 %365 }
  0xca   :  { %v361_v57 = vpop.permute.xlu0 %360 }
  0xcb   :  { %1031 = vmatmul.mubr.bf16.vlgmr.msra.gmra.mrb[0].mxu0 %v1104_v46 }
  0xcc   :  { %1034 = vmatprep.mubr.bf16.mxu0 %v1105_v3 }
  0xcd   :  { %v376_v63 = vpop.permute.xlu1 %375 }
  0xce   :  { %v371_v59 = vpop.permute.xlu0 %370 }
  0xd1   :  { %v386_v13 = vpop.permute.xlu1 %385 }
  0xd2   :  { %v381_v9 = vpop.permute.xlu0 %380 }
  0xd3   :  { %1035 = vmatmul.mubr.bf16.gmra.mrb[4].mxu0 %v1106_v47 }
  0xd4   :  { %1038 = vmatprep.mubr.bf16.mxu0 %v1107_v48 }
  0xd5   :  { %v396_v30 = vpop.permute.xlu1 %395 }
  0xd6   :  { %v391_v26 = vpop.permute.xlu0 %390 }
  0xd9   :  { %v406_v3 = vpop.permute.xlu1 %405 }
  0xda   :  { %v401_v40 = vpop.permute.xlu0 %400 }
  0xdb   :  { %1039 = vmatmul.mubr.bf16.gmra.mrb[8].mxu0 %v1108_v49 }
  0xdc   :  { %1042 = vmatprep.mubr.bf16.mxu0 %v1109_v50 }
  0xe3   :  { %1043 = vmatmul.mubr.bf16.gmra.mrb[12].mxu0 %v1110_v51 }
 0x19e   :  { %v1032_v60 = vpop.f32.mrb[0].mxu0 }
 0x19f   :  { %v509_v61 = vadd.f32 %v1032_v60, %v351_v55  ;;  %v500_v62 = vpop.f32.mrb[1].mxu0  ;;  %v416_v60 = vpop.permute.xlu1 %415 }
 0x1a0   :  { %v501_v0 = vadd.f32 %v500_v62, %v341_v53  ;;  %v1033_v1 = vpop.f32.mrb[2].mxu0  ;;  %v411_v53 = vpop.permute.xlu0 %410 }
 0x1a1   :  { %v565_v2 = vmul.f32 0.01, %v509_v61  ;;  %v512_v4 = vadd.f32 %v1033_v1, %v356_v56  ;;  %v503_v5 = vpop.f32.mrb[3].mxu0 }
 0x1a2   :  { %v563_v6 = vmul.f32 0.01, %v501_v0  ;;  %v504_v7 = vadd.f32 %v503_v5, %v346_v54 }
 0x1a3   :  { %v566_v8 = vmul.f32 0.01, %v512_v4  ;;  %v581_v11 = vmax.f32 %v509_v61, %v565_v2 }
 0x1a4   :  { %v564_v10 = vmul.f32 0.01, %v504_v7  ;;  %v579_v14 = vmax.f32 %v501_v0, %v563_v6 }
 0x1a5   :  { %v582_v12 = vmax.f32 %v512_v4, %v566_v8 }
 0x1a6   :  { %v580_v15 = vmax.f32 %v504_v7, %v564_v10  ;;  %v1036_v16 = vpop.f32.mrb[4].mxu0 }
 0x1a7   :  { %v525_v17 = vadd.f32 %v1036_v16, %v371_v59  ;;  %v516_v18 = vpop.f32.mrb[5].mxu0  ;;  %v596_v19 = vpack.c.bf16 %v582_v12, %v581_v11  ;;  %v1114_v16 = vld [vmem:[%s1458_s5 + $0x18] sm:$0xff]  }
 0x1a8   :  { %v517_v20 = vadd.f32 %v516_v18, %v361_v57  ;;  %v1037_v21 = vpop.f32.mrb[6].mxu0  ;;  %v595_v22 = vpack.c.bf16 %v580_v15, %v579_v14  ;;  %v1112_v14 = vld [vmem:[%s1458_s5 + $0x8] sm:$0xff]   ;;  %v1113_v15 = vld [vmem:[%s1458_s5 + $0x10] sm:$0xff]  }
 0x1a9   :  { %v569_v23 = vmul.f32 0.01, %v525_v17  ;;  %v528_v24 = vadd.f32 %v1037_v21, %v376_v63  ;;  %v519_v25 = vpop.f32.mrb[7].mxu0  ;;  %v1116_v18 = vld [vmem:[%s1458_s5 + $0x28] sm:$0xff]   ;;  %v1120_v21 = vmov 0.0  }
 0x1aa   :  { %v567_v27 = vmul.f32 0.01, %v517_v20  ;;  %v520_v28 = vadd.f32 %v519_v25, %v366_v58  ;;  %1046 = vmatprep.subr.bf16.mxu1 %v595_v22  ;;  %1078 = vmatprep.subr.bf16.mxu0 %v1120_v21 }
 0x1ab   :  { %v570_v29 = vmul.f32 0.01, %v528_v24  ;;  %1047 = vmatpush3.bf16.msra.mxu1 %v595_v22  ;;  %v585_v32 = vmax.f32 %v525_v17, %v569_v23  ;;  %v1115_v17 = vld [vmem:[%s1458_s5 + $0x20] sm:$0xff]   ;;  %1094 = vmatprep.mubr.msk.bf16.mxu0 %vm1121_vm0, %v1120_v21  ;;  %v638_v22 = vpop.permute.xlu0 %637  ;;  %v643_v23 = vpop.permute.xlu1 %642 }
 0x1ac   :  { %v568_v31 = vmul.f32 0.01, %v520_v28  ;;  %1048 = vmatprep.subr.bf16.mxu1 %v596_v19  ;;  %v583_v34 = vmax.f32 %v517_v20, %v567_v27  ;;  %v1118_v20 = vld [vmem:[%s1458_s5 + $0x38] sm:$0xff]  }
 0x1ad   :  { %v586_v33 = vmax.f32 %v528_v24, %v570_v29 }
 0x1ae   :  { %v584_v35 = vmax.f32 %v520_v28, %v568_v31  ;;  %v1040_v36 = vpop.f32.mrb[8].mxu0 }
 0x1af   :  { %v541_v37 = vadd.f32 %v1040_v36, %v391_v26  ;;  %v532_v38 = vpop.f32.mrb[9].mxu0  ;;  %1049 = vmatpush3.bf16.msra.mxu1 %v596_v19  ;;  %v598_v39 = vpack.c.bf16 %v586_v33, %v585_v32  ;;  %v1117_v19 = vld [vmem:[%s1458_s5 + $0x30] sm:$0xff]   ;;  %v648_v24 = vpop.permute.xlu0 %647 }
 0x1b0   :  { %v533_v41 = vadd.f32 %v532_v38, %v381_v9  ;;  %v1041_v42 = vpop.f32.mrb[10].mxu0  ;;  %v597_v43 = vpack.c.bf16 %v584_v35, %v583_v34  ;;  %v653_v25 = vpop.permute.xlu1 %652 }
 0x1b1   :  { %v573_v44 = vmul.f32 0.01, %v541_v37  ;;  %v544_v45 = vadd.f32 %v1041_v42, %v396_v30  ;;  %v535_v46 = vpop.f32.mrb[11].mxu0 }
 0x1b2   :  { %v571_v47 = vmul.f32 0.01, %v533_v41  ;;  %v536_v48 = vadd.f32 %v535_v46, %v386_v13  ;;  %1050 = vmatprep.subr.bf16.mxu1 %v597_v43 }
 0x1b3   :  { %v574_v49 = vmul.f32 0.01, %v544_v45  ;;  %1051 = vmatpush3.bf16.msra.mxu1 %v597_v43  ;;  %v589_v51 = vmax.f32 %v541_v37, %v573_v44  ;;  %v658_v26 = vpop.permute.xlu0 %657 }
 0x1b4   :  { %v572_v50 = vmul.f32 0.01, %v536_v48  ;;  %1052 = vmatprep.subr.bf16.mxu1 %v598_v39  ;;  %v587_v54 = vmax.f32 %v533_v41, %v571_v47  ;;  %v663_v27 = vpop.permute.xlu1 %662 }
 0x1b5   :  { %v590_v52 = vmax.f32 %v544_v45, %v574_v49 }
 0x1b6   :  { %v588_v55 = vmax.f32 %v536_v48, %v572_v50  ;;  %v1044_v56 = vpop.f32.mrb[12].mxu0 }
 0x1b7   :  { %v557_v57 = vadd.f32 %v1044_v56, %v411_v53  ;;  %v548_v58 = vpop.f32.mrb[13].mxu0  ;;  %1053 = vmatpush3.bf16.msra.mxu1 %v598_v39  ;;  %v600_v59 = vpack.c.bf16 %v590_v52, %v589_v51  ;;  %v668_v28 = vpop.permute.xlu0 %667 }
 0x1b8   :  { %v549_v61 = vadd.f32 %v548_v58, %v401_v40  ;;  %v1045_v62 = vpop.f32.mrb[14].mxu0  ;;  %v599_v63 = vpack.c.bf16 %v588_v55, %v587_v54  ;;  %v673_v32 = vpop.permute.xlu1 %672 }
 0x1b9   :  { %v577_v0 = vmul.f32 0.01, %v557_v57  ;;  %v560_v1 = vadd.f32 %v1045_v62, %v416_v60  ;;  %v551_v2 = vpop.f32.mrb[15].mxu0 }
 0x1ba   :  { %v575_v4 = vmul.f32 0.01, %v549_v61  ;;  %v552_v5 = vadd.f32 %v551_v2, %v406_v3  ;;  %1054 = vmatprep.subr.bf16.mxu1 %v599_v63 }
 0x1bb   :  { %v578_v6 = vmul.f32 0.01, %v560_v1  ;;  %1055 = vmatpush3.bf16.msra.mxu1 %v599_v63  ;;  %v593_v8 = vmax.f32 %v557_v57, %v577_v0  ;;  %v678_v41 = vpop.permute.xlu0 %677 }
 0x1bc   :  { %v576_v7 = vmul.f32 0.01, %v552_v5  ;;  %1056 = vmatprep.subr.bf16.mxu1 %v600_v59  ;;  %v591_v10 = vmax.f32 %v549_v61, %v575_v4  ;;  %v683_v45 = vpop.permute.xlu1 %682 }
 0x1bd   :  { %v594_v9 = vmax.f32 %v560_v1, %v578_v6 }
 0x1be   :  { %v592_v11 = vmax.f32 %v552_v5, %v576_v7 }
 0x1bf   :  { %1057 = vmatpush3.bf16.msra.mxu1 %v600_v59  ;;  %v602_v12 = vpack.c.bf16 %v594_v9, %v593_v8  ;;  %v688_v57 = vpop.permute.xlu0 %687 }
 0x1c0   :  { %v601_v13 = vpack.c.bf16 %v592_v11, %v591_v10  ;;  %v693_v61 = vpop.permute.xlu1 %692 }
 0x1c2   :  { %1058 = vmatprep.subr.bf16.mxu1 %v601_v13 }
 0x1c3   :  { %1059 = vmatpush3.bf16.msra.mxu1 %v601_v13  ;;  %v698_v8 = vpop.permute.xlu0 %697 }
 0x1c4   :  { %1060 = vmatprep.subr.bf16.mxu1 %v602_v12 }
 0x1c7   :  { %1061 = vmatpush3.bf16.msra.mxu1 %v602_v12 }
 0x1ca   :  { %1063 = vmatmul.mubr.bf16.vlgmr.msra.gmra.mrb[0].mxu1 %v1112_v14 }
 0x1cb   :  { %1066 = vmatprep.mubr.bf16.mxu1 %v1113_v15  ;;  %v703_v15 = vpop.permute.xlu1 %702 }
 0x1d2   :  { %1067 = vmatmul.mubr.bf16.gmra.mrb[4].mxu1 %v1114_v16 }
 0x1d3   :  { %1070 = vmatprep.mubr.bf16.mxu1 %v1115_v17 }
 0x1da   :  { %1071 = vmatmul.mubr.bf16.gmra.mrb[8].mxu1 %v1116_v18 }
 0x1db   :  { %1074 = vmatprep.mubr.bf16.mxu1 %v1117_v19 }
 0x1e2   :  { %1075 = vmatmul.mubr.bf16.gmra.mrb[12].mxu1 %v1118_v20 }
 0x29d   :  { %v1064_v29 = vpop.f32.mrb[0].mxu1 }
 0x29e   :  { %v806_v30 = vadd.f32 %v1064_v29, %v648_v24  ;;  %v797_v31 = vpop.f32.mrb[1].mxu1 }
 0x29f   :  { %v798_v33 = vadd.f32 %v797_v31, %v638_v22  ;;  %v1065_v34 = vpop.f32.mrb[2].mxu1 }
 0x2a0   :  { %v862_v35 = vmul.f32 0.01, %v806_v30  ;;  %v809_v36 = vadd.f32 %v1065_v34, %v653_v25  ;;  %v800_v37 = vpop.f32.mrb[3].mxu1 }
 0x2a1   :  { %v860_v38 = vmul.f32 0.01, %v798_v33  ;;  %v801_v39 = vadd.f32 %v800_v37, %v643_v23  ;;  %v708_v23 = vpop.permute.xlu0 %707 }
 0x2a2   :  { %v863_v40 = vmul.f32 0.01, %v809_v36  ;;  %v878_v43 = vmax.f32 %v806_v30, %v862_v35  ;;  %v713_v30 = vpop.permute.xlu1 %712 }
 0x2a3   :  { %v861_v42 = vmul.f32 0.01, %v801_v39  ;;  %v876_v46 = vmax.f32 %v798_v33, %v860_v38 }
 0x2a4   :  { %v879_v44 = vmax.f32 %v809_v36, %v863_v40 }
 0x2a5   :  { %v877_v3 = vmax.f32 %v801_v39, %v861_v42  ;;  %v1068_v47 = vpop.f32.mrb[4].mxu1 }
 0x2a6   :  { %v893_v48 = vpack.c.bf16 %v879_v44, %v878_v43  ;;  %v822_v49 = vadd.f32 %v1068_v47, %v668_v28  ;;  %v813_v50 = vpop.f32.mrb[5].mxu1  ;;  %v907_v47 = vlaneseq }
 0x2a7   :  { %v892_v51 = vpack.c.bf16 %v877_v3, %v876_v46  ;;  %v814_v52 = vadd.f32 %v813_v50, %v658_v26  ;;  %v1069_v53 = vpop.f32.mrb[6].mxu1  ;;  %v900_v3 = vld [vmem:[%s1459_s7] sm:$0x1]  ;;  %v905_v50 = vpop.permute.xlu0 %904 }
 0x2a8   :  { %v866_v54 = vmul.f32 0.01, %v822_v49  ;;  %v825_v55 = vadd.f32 %v1069_v53, %v673_v32  ;;  %v816_v56 = vpop.f32.mrb[7].mxu1 }
 0x2a9   :  { %v864_v58 = vmul.f32 0.01, %v814_v52  ;;  %v817_v59 = vadd.f32 %v816_v56, %v663_v27  ;;  %1079 = vmatpush3.bf16.msra.mxu0 %v892_v51 }
 0x2aa   :  { %v867_v60 = vmul.f32 0.01, %v825_v55  ;;  %1080 = vmatprep.subr.bf16.mxu0 %v1120_v21  ;;  %v882_v63 = vmax.f32 %v822_v49, %v866_v54 }
 0x2ab   :  { %v865_v62 = vmul.f32 0.01, %v817_v59  ;;  %v880_v1 = vmax.f32 %v814_v52, %v864_v58 }
 0x2ac   :  { %v883_v0 = vmax.f32 %v825_v55, %v867_v60 }
 0x2ad   :  { %v881_v2 = vmax.f32 %v817_v59, %v865_v62  ;;  %v1072_v4 = vpop.f32.mrb[8].mxu1  ;;  %1081 = vmatpush3.bf16.msra.mxu0 %v893_v48  ;;  %v908_v48 = vshrl.u32 %v907_v47, 7 }
 0x2ae   :  { %v895_v5 = vpack.c.bf16 %v883_v0, %v882_v63  ;;  %v838_v6 = vadd.f32 %v1072_v4, %v688_v57  ;;  %v829_v7 = vpop.f32.mrb[9].mxu1  ;;  %1082 = vmatprep.subr.bf16.mxu0 %v1120_v21 }
 0x2af   :  { %v894_v9 = vpack.c.bf16 %v881_v2, %v880_v1  ;;  %v830_v10 = vadd.f32 %v829_v7, %v678_v41  ;;  %v1073_v11 = vpop.f32.mrb[10].mxu1  ;;  %v909_v49 = vsub.s32 0, %v908_v48 }
 0x2b0   :  { %v870_v12 = vmul.f32 0.01, %v838_v6  ;;  %v841_v13 = vadd.f32 %v1073_v11, %v693_v61  ;;  %v832_v14 = vpop.f32.mrb[11].mxu1 }
 0x2b1   :  { %v868_v16 = vmul.f32 0.01, %v830_v10  ;;  %v833_v17 = vadd.f32 %v832_v14, %v683_v45  ;;  %1083 = vmatpush3.bf16.msra.mxu0 %v894_v9  ;;  %v910_v51 = vrot.slane %v905_v50, %v909_v49 }
 0x2b2   :  { %v871_v18 = vmul.f32 0.01, %v841_v13  ;;  %1084 = vmatprep.subr.bf16.mxu0 %v1120_v21  ;;  %v886_v20 = vmax.f32 %v838_v6, %v870_v12 }
 0x2b3   :  { %v869_v19 = vmul.f32 0.01, %v833_v17  ;;  %v884_v24 = vmax.f32 %v830_v10, %v868_v16 }
 0x2b4   :  { %v887_v22 = vmax.f32 %v841_v13, %v871_v18 }
 0x2b5   :  { %v885_v25 = vmax.f32 %v833_v17, %v869_v19  ;;  %v1076_v26 = vpop.f32.mrb[12].mxu1  ;;  %1085 = vmatpush3.bf16.msra.mxu0 %v895_v5 }
 0x2b6   :  { %v897_v27 = vpack.c.bf16 %v887_v22, %v886_v20  ;;  %v854_v28 = vadd.f32 %v1076_v26, %v708_v23  ;;  %v845_v29 = vpop.f32.mrb[13].mxu1  ;;  %1086 = vmatprep.subr.bf16.mxu0 %v1120_v21 }
 0x2b7   :  { %v896_v31 = vpack.c.bf16 %v885_v25, %v884_v24  ;;  %v846_v32 = vadd.f32 %v845_v29, %v698_v8  ;;  %v1077_v33 = vpop.f32.mrb[14].mxu1 }
 0x2b8   :  { %v874_v34 = vmul.f32 0.01, %v854_v28  ;;  %v857_v35 = vadd.f32 %v1077_v33, %v713_v30  ;;  %v848_v36 = vpop.f32.mrb[15].mxu1 }
 0x2b9   :  { %v872_v37 = vmul.f32 0.01, %v846_v32  ;;  %v849_v38 = vadd.f32 %v848_v36, %v703_v15  ;;  %1087 = vmatpush3.bf16.msra.mxu0 %v896_v31 }
 0x2ba   :  { %v875_v39 = vmul.f32 0.01, %v857_v35  ;;  %1088 = vmatprep.subr.bf16.mxu0 %v1120_v21  ;;  %v890_v41 = vmax.f32 %v854_v28, %v874_v34 }
 0x2bb   :  { %v873_v40 = vmul.f32 0.01, %v849_v38  ;;  %v888_v43 = vmax.f32 %v846_v32, %v872_v37 }
 0x2bc   :  { %v891_v42 = vmax.f32 %v857_v35, %v875_v39 }
 0x2bd   :  { %v889_v44 = vmax.f32 %v849_v38, %v873_v40  ;;  %1089 = vmatpush3.bf16.msra.mxu0 %v897_v27 }
 0x2be   :  { %v899_v45 = vpack.c.bf16 %v891_v42, %v890_v41  ;;  %1090 = vmatprep.subr.bf16.mxu0 %v1120_v21 }
 0x2bf   :  { %v898_v46 = vpack.c.bf16 %v889_v44, %v888_v43 }
 0x2c1   :  { %1091 = vmatpush3.bf16.msra.mxu0 %v898_v46 }
 0x2c2   :  { %1092 = vmatprep.subr.bf16.mxu0 %v1120_v21 }
 0x2c5   :  { %1093 = vmatpush3.bf16.msra.mxu0 %v899_v45 }
 0x2c8   :  { %1095 = vmatmul.mubr.bf16.vlgmr.msra.gmra.mrb[16].mxu0 %v900_v3 }
 0x39b   :  { %v945_v52 = vpop.f32.mrb[16].mxu0 }
 0x39c   :  { %v946_v53 = vadd.f32 %v945_v52, %v910_v51  ;;  %v1096_v54 = vpop.f32.mrb[17].mxu0 }
 0x39d   :  { %v948_v55 = vpop.f32.mrb[18].mxu0 }
 0x39e   :  { %951 = vst [vmem:[%s1460_s9] sm:$0x1] %v946_v53  ;;  %v1097_v21 = vpop.f32.mrb[19].mxu0 }

</bundles_post_ra>
